<compile_context>
chip_gen: v6e
topology: v6e:2x2x1
jax: 0.10.0
libtpu: 0.0.40
codegen_flags: <defaults>
</compile_context>

<pallas_src>
import functools

import jax
import jax.numpy as jnp
from jax.experimental import pallas as pl
from jax.experimental.pallas import tpu as pltpu

EPS = 1e-5
_INV_SQRT2 = 0.7071067811865476


def _conv_tile(x, w, *, c_in, ks, stride, l_out):
    """Conv1d on one batch tile as K = C_in*ks VPU broadcast-MACs.

    x: (TN, C_in, S, L_need) f32 phase-split input tile
    w: (K, C_out, 1)         f32 conv weight (bias dropped: exact under train BN)
    returns (TN, C_out, L_out) f32

    TODO(synk): for large K*C_out this contraction should move to the MXU as a
    single (C_out, K) @ (K, TN*L_out) dot (needs a lane-flattened view of the
    taps); the VPU MAC path is kept for toy K*C_out per the review guidance.
    """
    y = None
    for ci in range(c_in):
        for t in range(ks):
            k = ci * ks + t
            q = t // stride
            tap = x[:, ci, t % stride, q:q + l_out]      # (TN, L_out), static slice
            term = w[k][None] * tap[:, None, :]          # (TN, C_out, L_out)
            y = term if y is None else y + term
    return y


def _stats_kernel(x_ref, w_ref, stats_ref, acc_ref, *, c_in, ks, stride, l_out):
    """Pass 1: conv on the tile + per-channel sum / sumsq accumulation in VMEM.

    x_ref:     (TN, C_in, S, L_need)  phase-split input tile
    w_ref:     (K, C_out, 1)          conv weight
    stats_ref: (1, 2, C_out, 1)       this core's partial [sum, sumsq] (HBM out)
    acc_ref:   (2, C_out, 1)          VMEM scratch accumulator (persists over grid)
    """
    i = pl.program_id(1)
    n_i = pl.num_programs(1)

    @pl.when(i == 0)
    def _init():
        acc_ref[...] = jnp.zeros_like(acc_ref)

    x = x_ref[...].astype(jnp.float32)
    w = w_ref[...].astype(jnp.float32)
    y = _conv_tile(x, w, c_in=c_in, ks=ks, stride=stride, l_out=l_out)

    # Per-channel batch statistics over (batch-tile, L_out), f32 accumulation.
    s = jnp.sum(jnp.sum(y, axis=2, keepdims=True), axis=0)        # (C_out, 1)
    sq = jnp.sum(jnp.sum(y * y, axis=2, keepdims=True), axis=0)   # (C_out, 1)
    acc_ref[0] += s
    acc_ref[1] += sq

    @pl.when(i == n_i - 1)
    def _flush():
        stats_ref[0] = acc_ref[...]   # single tiny HBM write per core


def _apply_kernel(stats_ref, x_ref, w_ref, gamma_ref, beta_ref, o_ref, *,
                  c_in, ks, stride, l_out, inv_count):
    """Pass 2: combine partials, finalize BN, recompute conv, BN + exact GELU."""
    tot = jnp.sum(stats_ref[...].astype(jnp.float32), axis=0)     # (2, C_out, 1)
    mean = tot[0] * inv_count                                     # (C_out, 1)
    # TODO(synk): E[y^2] - mean^2 in f32 can lose precision for very large N*L;
    # switch to a shifted / two-pass variance if that regime matters.
    var = jnp.maximum(tot[1] * inv_count - mean * mean, 0.0)
    scale = gamma_ref[...] * jax.lax.rsqrt(var + EPS)             # (C_out, 1)
    shift = beta_ref[...] - mean * scale

    x = x_ref[...].astype(jnp.float32)
    w = w_ref[...].astype(jnp.float32)
    y = _conv_tile(x, w, c_in=c_in, ks=ks, stride=stride, l_out=l_out)
    z = y * scale[None] + shift[None]
    o_ref[...] = (0.5 * z * (1.0 + jax.lax.erf(z * _INV_SQRT2))).astype(o_ref.dtype)


def _round_up(v, m):
    return ((v + m - 1) // m) * m


def _vmem_limit_bytes():
    # Generation-aware VMEM limit: v5e/v6e have 128 MiB per core, v7x only 64 MiB.
    try:
        cap = int(pltpu.get_tpu_info().vmem_capacity_bytes)
    except Exception:
        cap = 64 << 20   # conservative fallback (safe on v7x's 64 MiB parts)
    return int(min(max(cap * 3 // 4, 32 << 20), 112 << 20))


def _pick_batch_tile(n, c_in, s, l_need, c_out, l_out, vmem_limit):
    """Largest batch tile whose double-buffered in/out blocks fit the budget."""
    # Bytes per batch row after (8,128) VMEM tile padding.
    row_in = 4 * c_in * _round_up(s, 8) * _round_up(l_need, 128)
    row_out = 4 * _round_up(c_out, 8) * _round_up(l_out, 128)
    budget = max(vmem_limit // 3, 4 << 20)          # leave headroom for scratch etc.
    tn = budget // (2 * (row_in + row_out))         # 2x: BlockSpec double-buffering
    return int(max(1, min(n, tn)))


@functools.partial(jax.jit, static_argnames=("ks", "stride"))
def conv_bn_gelu_forward(x, weight, bias, gamma, beta, *, ks, stride):
    """x: (N, C_in, L) f32; weight: (C_out, C_in, ks).  Returns (N, C_out, L_out).

    `bias` is accepted for API parity but unused: a per-channel conv bias is
    removed exactly by train-mode BatchNorm (y - mean(y) is bias-independent).
    """
    del bias
    N, C_in, L = x.shape
    C_out = weight.shape[0]
    pad = (ks - 1) // 2
    L_pad = L + 2 * pad
    L_out = (L_pad - ks) // stride + 1
    K = C_in * ks
    S = stride
    L_need = L_out + (ks - 1) // stride     # per-phase length needed by the taps
    L_tot = S * L_need

    # Duplication-free phase-split view: x_ph[n,ci,r,q] = x_pad[n,ci,q*stride+r].
    x_pad = jnp.pad(x, ((0, 0), (0, 0), (pad, pad)))
    if L_tot > L_pad:
        x_pad = jnp.pad(x_pad, ((0, 0), (0, 0), (0, L_tot - L_pad)))
    else:
        x_pad = x_pad[:, :, :L_tot]
    x_ph = x_pad.reshape(N, C_in, L_need, S).transpose(0, 1, 3, 2)   # (N,C_in,S,L_need)

    # Weight as (K, C_out, 1): per-k row broadcasts over lanes without relayout.
    w3 = weight.reshape(C_out, K).T[:, :, None].astype(jnp.float32)
    gamma2 = gamma.reshape(C_out, 1).astype(jnp.float32)
    beta2 = beta.reshape(C_out, 1).astype(jnp.float32)

    vmem_limit = _vmem_limit_bytes()
    TN = _pick_batch_tile(N, C_in, S, L_need, C_out, L_out, vmem_limit)
    num_tiles = pl.cdiv(N, TN)
    NC = 2 if num_tiles >= 2 else 1          # split the stats pass across v7x cores
    TPC = pl.cdiv(num_tiles, NC)             # tiles per core
    N_pad = NC * TPC * TN
    if N_pad != N:
        # Zero rows contribute exactly 0 to the bias-free sum / sum-of-squares;
        # the divisor below uses the true N*L_out.
        x_ph = jnp.pad(x_ph, ((0, N_pad - N), (0, 0), (0, 0), (0, 0)))

    kcommon = dict(c_in=C_in, ks=ks, stride=stride, l_out=L_out)

    # ---- Pass 1: per-core partial batch statistics (no big HBM output) ----
    partial_stats = pl.pallas_call(
        functools.partial(_stats_kernel, **kcommon),
        out_shape=jax.ShapeDtypeStruct((NC, 2, C_out, 1), jnp.float32),
        grid=(NC, TPC),
        in_specs=[
            pl.BlockSpec((TN, C_in, S, L_need), lambda c, i: (c * TPC + i, 0, 0, 0)),
            pl.BlockSpec((K, C_out, 1), lambda c, i: (0, 0, 0)),
        ],
        out_specs=pl.BlockSpec((1, 2, C_out, 1), lambda c, i: (c, 0, 0, 0)),
        scratch_shapes=[pltpu.VMEM((2, C_out, 1), jnp.float32)],
        compiler_params=pltpu.CompilerParams(
            dimension_semantics=("parallel", "arbitrary"),
            vmem_limit_bytes=vmem_limit),
    )(x_ph, w3)

    # ---- Pass 2: finalize BN, recompute conv, normalize + exact GELU ----
    out = pl.pallas_call(
        functools.partial(_apply_kernel, inv_count=1.0 / float(N * L_out), **kcommon),
        out_shape=jax.ShapeDtypeStruct((N_pad, C_out, L_out), jnp.float32),
        grid=(NC * TPC,),
        in_specs=[
            pl.BlockSpec((NC, 2, C_out, 1), lambda i: (0, 0, 0, 0)),
            pl.BlockSpec((TN, C_in, S, L_need), lambda i: (i, 0, 0, 0)),
            pl.BlockSpec((K, C_out, 1), lambda i: (0, 0, 0)),
            pl.BlockSpec((C_out, 1), lambda i: (0, 0)),
            pl.BlockSpec((C_out, 1), lambda i: (0, 0)),
        ],
        out_specs=pl.BlockSpec((TN, C_out, L_out), lambda i: (i, 0, 0)),
        compiler_params=pltpu.CompilerParams(
            dimension_semantics=("parallel",),
            vmem_limit_bytes=vmem_limit),
    )(partial_stats, x_ph, w3, gamma2, beta2)

    return out[:N]


def _reference(x, weight, bias, gamma, beta, *, ks, stride):
    """Pure-JAX reference reproducing the PyTorch forward (with conv bias)."""
    pad = (ks - 1) // 2
    y = jax.lax.conv_general_dilated(
        x, weight, window_strides=(stride,), padding=[(pad, pad)],
        dimension_numbers=("NCW", "OIW", "NCW"))
    y = y + bias[None, :, None]
    mean = jnp.mean(y, axis=(0, 2), keepdims=True)
    var = jnp.mean((y - mean) ** 2, axis=(0, 2), keepdims=True)
    z = gamma[None, :, None] * (y - mean) * jax.lax.rsqrt(var + EPS) + beta[None, :, None]
    return 0.5 * z * (1.0 + jax.lax.erf(z / jnp.sqrt(2.0)))


if __name__ == "__main__":
    # Module hyperparameters consistent with ConvBNReLU(nin, nout, ks, stride).
    nin, nout, ks, stride = 4, 8, 3, 2
    N, L = 2, 16

    key = jax.random.PRNGKey(0)
    k_x, k_w, k_b = jax.random.split(key, 3)

    x = jax.random.normal(k_x, (N, nin, L), dtype=jnp.float32)
    weight = 0.1 * jax.random.normal(k_w, (nout, nin, ks), dtype=jnp.float32)
    bias = 0.1 * jax.random.normal(k_b, (nout,), dtype=jnp.float32)
    gamma = jnp.ones((nout,), dtype=jnp.float32)   # BatchNorm1d weight init
    beta = jnp.zeros((nout,), dtype=jnp.float32)   # BatchNorm1d bias init

    out = conv_bn_gelu_forward(x, weight, bias, gamma, beta, ks=ks, stride=stride)
    out = jax.block_until_ready(out)

    ref = _reference(x, weight, bias, gamma, beta, ks=ks, stride=stride)
    L_out = (L + 2 * ((ks - 1) // 2) - ks) // stride + 1
    assert out.shape == ref.shape == (N, nout, L_out)
    assert jnp.allclose(out, ref, rtol=1e-5, atol=1e-5), "mismatch vs reference"

    print("KERNEL_OK")
</pallas_src>

<mosaic_0001>
module attributes {stable_mosaic.version = 11 : i64} {
  func.func @_stats_kernel(%arg0: i32, %arg1: i32, %arg2: memref<2x4x2x9xf32, #tpu.memory_space<vmem>>, %arg3: memref<12x8x1xf32, #tpu.memory_space<vmem>>, %arg4: memref<1x2x8x1xf32, #tpu.memory_space<vmem>>, %arg5: memref<2x8x1xf32, #tpu.memory_space<vmem>>) attributes {dimension_semantics = [#tpu.dimension_semantics<parallel>, #tpu.dimension_semantics<arbitrary>], iteration_bounds = array<i64: 1, 1>, scalar_prefetch = 0 : i64, scratch_operands = 1 : i64, tpu.core_type = #tpu.core_type<tc>, window_params = [{transform_indices = @transform_0, window_bounds = array<i64: 2, 4, 2, 9>}, {pipeline_mode = #tpu.pipeline_mode<synchronous>, transform_indices = @transform_1, window_bounds = array<i64: 12, 8, 1>}, {transform_indices = @transform_2, window_bounds = array<i64: 1, 2, 8, 1>}]} {
    %c0_i32 = arith.constant 0 : i32
    %0 = arith.cmpi eq, %arg1, %c0_i32 : i32
    %1 = arith.extui %0 : i1 to i32
    %c0_i32_0 = arith.constant 0 : i32
    %2 = arith.cmpi ne, %1, %c0_i32_0 : i32
    scf.if %2 {
      %cst_23 = arith.constant 0.000000e+00 : f32
      %146 = vector.broadcast %cst_23 : f32 to vector<2x8x1xf32>
      %c0_24 = arith.constant 0 : index
      %c0_25 = arith.constant 0 : index
      %c0_26 = arith.constant 0 : index
      %147 = vector.load %arg5[%c0_24, %c0_25, %c0_26] : memref<2x8x1xf32, #tpu.memory_space<vmem>>, vector<2x8x1xf32>
      tpu.vector_store %arg5[%c0_24, %c0_25, %c0_26], %146 {strides = array<i32>} : memref<2x8x1xf32, #tpu.memory_space<vmem>>, vector<2x8x1xf32>,
    } else {
    }
    %c0 = arith.constant 0 : index
    %c0_1 = arith.constant 0 : index
    %c0_2 = arith.constant 0 : index
    %c0_3 = arith.constant 0 : index
    %3 = vector.load %arg2[%c0, %c0_1, %c0_2, %c0_3] : memref<2x4x2x9xf32, #tpu.memory_space<vmem>>, vector<2x4x2x9xf32>
    %c0_4 = arith.constant 0 : index
    %c0_5 = arith.constant 0 : index
    %c0_6 = arith.constant 0 : index
    %4 = vector.load %arg3[%c0_4, %c0_5, %c0_6] : memref<12x8x1xf32, #tpu.memory_space<vmem>>, vector<12x8x1xf32>
    %5 = vector.extract_strided_slice %3 {offsets = [0, 0, 0, 0], sizes = [2, 1, 1, 8], strides = [1, 1, 1, 1]} : vector<2x4x2x9xf32> to vector<2x1x1x8xf32>
    %6 = vector.shape_cast %5 : vector<2x1x1x8xf32> to vector<2x8xf32>
    %7 = vector.extract_strided_slice %4 {offsets = [0, 0, 0], sizes = [1, 8, 1], strides = [1, 1, 1]} : vector<12x8x1xf32> to vector<1x8x1xf32>
    %8 = vector.shape_cast %7 : vector<1x8x1xf32> to vector<8x1xf32>
    %9 = vector.shape_cast %8 : vector<8x1xf32> to vector<1x8x1xf32>
    %10 = vector.shape_cast %6 : vector<2x8xf32> to vector<2x1x8xf32>
    %11 = vector.broadcast %9 : vector<1x8x1xf32> to vector<2x8x8xf32>
    %12 = vector.broadcast %10 : vector<2x1x8xf32> to vector<2x8x8xf32>
    %13 = arith.mulf %11, %12 : vector<2x8x8xf32>
    %14 = vector.extract_strided_slice %3 {offsets = [0, 0, 1, 0], sizes = [2, 1, 1, 8], strides = [1, 1, 1, 1]} : vector<2x4x2x9xf32> to vector<2x1x1x8xf32>
    %15 = vector.shape_cast %14 : vector<2x1x1x8xf32> to vector<2x8xf32>
    %16 = vector.extract_strided_slice %4 {offsets = [1, 0, 0], sizes = [1, 8, 1], strides = [1, 1, 1]} : vector<12x8x1xf32> to vector<1x8x1xf32>
    %17 = vector.shape_cast %16 : vector<1x8x1xf32> to vector<8x1xf32>
    %18 = vector.shape_cast %17 : vector<8x1xf32> to vector<1x8x1xf32>
    %19 = vector.shape_cast %15 : vector<2x8xf32> to vector<2x1x8xf32>
    %20 = vector.broadcast %18 : vector<1x8x1xf32> to vector<2x8x8xf32>
    %21 = vector.broadcast %19 : vector<2x1x8xf32> to vector<2x8x8xf32>
    %22 = arith.mulf %20, %21 : vector<2x8x8xf32>
    %23 = arith.addf %13, %22 : vector<2x8x8xf32>
    %24 = vector.extract_strided_slice %3 {offsets = [0, 0, 0, 1], sizes = [2, 1, 1, 8], strides = [1, 1, 1, 1]} : vector<2x4x2x9xf32> to vector<2x1x1x8xf32>
    %25 = vector.shape_cast %24 : vector<2x1x1x8xf32> to vector<2x8xf32>
    %26 = vector.extract_strided_slice %4 {offsets = [2, 0, 0], sizes = [1, 8, 1], strides = [1, 1, 1]} : vector<12x8x1xf32> to vector<1x8x1xf32>
    %27 = vector.shape_cast %26 : vector<1x8x1xf32> to vector<8x1xf32>
    %28 = vector.shape_cast %27 : vector<8x1xf32> to vector<1x8x1xf32>
    %29 = vector.shape_cast %25 : vector<2x8xf32> to vector<2x1x8xf32>
    %30 = vector.broadcast %28 : vector<1x8x1xf32> to vector<2x8x8xf32>
    %31 = vector.broadcast %29 : vector<2x1x8xf32> to vector<2x8x8xf32>
    %32 = arith.mulf %30, %31 : vector<2x8x8xf32>
    %33 = arith.addf %23, %32 : vector<2x8x8xf32>
    %34 = vector.extract_strided_slice %3 {offsets = [0, 1, 0, 0], sizes = [2, 1, 1, 8], strides = [1, 1, 1, 1]} : vector<2x4x2x9xf32> to vector<2x1x1x8xf32>
    %35 = vector.shape_cast %34 : vector<2x1x1x8xf32> to vector<2x8xf32>
    %36 = vector.extract_strided_slice %4 {offsets = [3, 0, 0], sizes = [1, 8, 1], strides = [1, 1, 1]} : vector<12x8x1xf32> to vector<1x8x1xf32>
    %37 = vector.shape_cast %36 : vector<1x8x1xf32> to vector<8x1xf32>
    %38 = vector.shape_cast %37 : vector<8x1xf32> to vector<1x8x1xf32>
    %39 = vector.shape_cast %35 : vector<2x8xf32> to vector<2x1x8xf32>
    %40 = vector.broadcast %38 : vector<1x8x1xf32> to vector<2x8x8xf32>
    %41 = vector.broadcast %39 : vector<2x1x8xf32> to vector<2x8x8xf32>
    %42 = arith.mulf %40, %41 : vector<2x8x8xf32>
    %43 = arith.addf %33, %42 : vector<2x8x8xf32>
    %44 = vector.extract_strided_slice %3 {offsets = [0, 1, 1, 0], sizes = [2, 1, 1, 8], strides = [1, 1, 1, 1]} : vector<2x4x2x9xf32> to vector<2x1x1x8xf32>
    %45 = vector.shape_cast %44 : vector<2x1x1x8xf32> to vector<2x8xf32>
    %46 = vector.extract_strided_slice %4 {offsets = [4, 0, 0], sizes = [1, 8, 1], strides = [1, 1, 1]} : vector<12x8x1xf32> to vector<1x8x1xf32>
    %47 = vector.shape_cast %46 : vector<1x8x1xf32> to vector<8x1xf32>
    %48 = vector.shape_cast %47 : vector<8x1xf32> to vector<1x8x1xf32>
    %49 = vector.shape_cast %45 : vector<2x8xf32> to vector<2x1x8xf32>
    %50 = vector.broadcast %48 : vector<1x8x1xf32> to vector<2x8x8xf32>
    %51 = vector.broadcast %49 : vector<2x1x8xf32> to vector<2x8x8xf32>
    %52 = arith.mulf %50, %51 : vector<2x8x8xf32>
    %53 = arith.addf %43, %52 : vector<2x8x8xf32>
    %54 = vector.extract_strided_slice %3 {offsets = [0, 1, 0, 1], sizes = [2, 1, 1, 8], strides = [1, 1, 1, 1]} : vector<2x4x2x9xf32> to vector<2x1x1x8xf32>
    %55 = vector.shape_cast %54 : vector<2x1x1x8xf32> to vector<2x8xf32>
    %56 = vector.extract_strided_slice %4 {offsets = [5, 0, 0], sizes = [1, 8, 1], strides = [1, 1, 1]} : vector<12x8x1xf32> to vector<1x8x1xf32>
    %57 = vector.shape_cast %56 : vector<1x8x1xf32> to vector<8x1xf32>
    %58 = vector.shape_cast %57 : vector<8x1xf32> to vector<1x8x1xf32>
    %59 = vector.shape_cast %55 : vector<2x8xf32> to vector<2x1x8xf32>
    %60 = vector.broadcast %58 : vector<1x8x1xf32> to vector<2x8x8xf32>
    %61 = vector.broadcast %59 : vector<2x1x8xf32> to vector<2x8x8xf32>
    %62 = arith.mulf %60, %61 : vector<2x8x8xf32>
    %63 = arith.addf %53, %62 : vector<2x8x8xf32>
    %64 = vector.extract_strided_slice %3 {offsets = [0, 2, 0, 0], sizes = [2, 1, 1, 8], strides = [1, 1, 1, 1]} : vector<2x4x2x9xf32> to vector<2x1x1x8xf32>
    %65 = vector.shape_cast %64 : vector<2x1x1x8xf32> to vector<2x8xf32>
    %66 = vector.extract_strided_slice %4 {offsets = [6, 0, 0], sizes = [1, 8, 1], strides = [1, 1, 1]} : vector<12x8x1xf32> to vector<1x8x1xf32>
    %67 = vector.shape_cast %66 : vector<1x8x1xf32> to vector<8x1xf32>
    %68 = vector.shape_cast %67 : vector<8x1xf32> to vector<1x8x1xf32>
    %69 = vector.shape_cast %65 : vector<2x8xf32> to vector<2x1x8xf32>
    %70 = vector.broadcast %68 : vector<1x8x1xf32> to vector<2x8x8xf32>
    %71 = vector.broadcast %69 : vector<2x1x8xf32> to vector<2x8x8xf32>
    %72 = arith.mulf %70, %71 : vector<2x8x8xf32>
    %73 = arith.addf %63, %72 : vector<2x8x8xf32>
    %74 = vector.extract_strided_slice %3 {offsets = [0, 2, 1, 0], sizes = [2, 1, 1, 8], strides = [1, 1, 1, 1]} : vector<2x4x2x9xf32> to vector<2x1x1x8xf32>
    %75 = vector.shape_cast %74 : vector<2x1x1x8xf32> to vector<2x8xf32>
    %76 = vector.extract_strided_slice %4 {offsets = [7, 0, 0], sizes = [1, 8, 1], strides = [1, 1, 1]} : vector<12x8x1xf32> to vector<1x8x1xf32>
    %77 = vector.shape_cast %76 : vector<1x8x1xf32> to vector<8x1xf32>
    %78 = vector.shape_cast %77 : vector<8x1xf32> to vector<1x8x1xf32>
    %79 = vector.shape_cast %75 : vector<2x8xf32> to vector<2x1x8xf32>
    %80 = vector.broadcast %78 : vector<1x8x1xf32> to vector<2x8x8xf32>
    %81 = vector.broadcast %79 : vector<2x1x8xf32> to vector<2x8x8xf32>
    %82 = arith.mulf %80, %81 : vector<2x8x8xf32>
    %83 = arith.addf %73, %82 : vector<2x8x8xf32>
    %84 = vector.extract_strided_slice %3 {offsets = [0, 2, 0, 1], sizes = [2, 1, 1, 8], strides = [1, 1, 1, 1]} : vector<2x4x2x9xf32> to vector<2x1x1x8xf32>
    %85 = vector.shape_cast %84 : vector<2x1x1x8xf32> to vector<2x8xf32>
    %86 = vector.extract_strided_slice %4 {offsets = [8, 0, 0], sizes = [1, 8, 1], strides = [1, 1, 1]} : vector<12x8x1xf32> to vector<1x8x1xf32>
    %87 = vector.shape_cast %86 : vector<1x8x1xf32> to vector<8x1xf32>
    %88 = vector.shape_cast %87 : vector<8x1xf32> to vector<1x8x1xf32>
    %89 = vector.shape_cast %85 : vector<2x8xf32> to vector<2x1x8xf32>
    %90 = vector.broadcast %88 : vector<1x8x1xf32> to vector<2x8x8xf32>
    %91 = vector.broadcast %89 : vector<2x1x8xf32> to vector<2x8x8xf32>
    %92 = arith.mulf %90, %91 : vector<2x8x8xf32>
    %93 = arith.addf %83, %92 : vector<2x8x8xf32>
    %94 = vector.extract_strided_slice %3 {offsets = [0, 3, 0, 0], sizes = [2, 1, 1, 8], strides = [1, 1, 1, 1]} : vector<2x4x2x9xf32> to vector<2x1x1x8xf32>
    %95 = vector.shape_cast %94 : vector<2x1x1x8xf32> to vector<2x8xf32>
    %96 = vector.extract_strided_slice %4 {offsets = [9, 0, 0], sizes = [1, 8, 1], strides = [1, 1, 1]} : vector<12x8x1xf32> to vector<1x8x1xf32>
    %97 = vector.shape_cast %96 : vector<1x8x1xf32> to vector<8x1xf32>
    %98 = vector.shape_cast %97 : vector<8x1xf32> to vector<1x8x1xf32>
    %99 = vector.shape_cast %95 : vector<2x8xf32> to vector<2x1x8xf32>
    %100 = vector.broadcast %98 : vector<1x8x1xf32> to vector<2x8x8xf32>
    %101 = vector.broadcast %99 : vector<2x1x8xf32> to vector<2x8x8xf32>
    %102 = arith.mulf %100, %101 : vector<2x8x8xf32>
    %103 = arith.addf %93, %102 : vector<2x8x8xf32>
    %104 = vector.extract_strided_slice %3 {offsets = [0, 3, 1, 0], sizes = [2, 1, 1, 8], strides = [1, 1, 1, 1]} : vector<2x4x2x9xf32> to vector<2x1x1x8xf32>
    %105 = vector.shape_cast %104 : vector<2x1x1x8xf32> to vector<2x8xf32>
    %106 = vector.extract_strided_slice %4 {offsets = [10, 0, 0], sizes = [1, 8, 1], strides = [1, 1, 1]} : vector<12x8x1xf32> to vector<1x8x1xf32>
    %107 = vector.shape_cast %106 : vector<1x8x1xf32> to vector<8x1xf32>
    %108 = vector.shape_cast %107 : vector<8x1xf32> to vector<1x8x1xf32>
    %109 = vector.shape_cast %105 : vector<2x8xf32> to vector<2x1x8xf32>
    %110 = vector.broadcast %108 : vector<1x8x1xf32> to vector<2x8x8xf32>
    %111 = vector.broadcast %109 : vector<2x1x8xf32> to vector<2x8x8xf32>
    %112 = arith.mulf %110, %111 : vector<2x8x8xf32>
    %113 = arith.addf %103, %112 : vector<2x8x8xf32>
    %114 = vector.extract_strided_slice %3 {offsets = [0, 3, 0, 1], sizes = [2, 1, 1, 8], strides = [1, 1, 1, 1]} : vector<2x4x2x9xf32> to vector<2x1x1x8xf32>
    %115 = vector.shape_cast %114 : vector<2x1x1x8xf32> to vector<2x8xf32>
    %116 = vector.extract_strided_slice %4 {offsets = [11, 0, 0], sizes = [1, 8, 1], strides = [1, 1, 1]} : vector<12x8x1xf32> to vector<1x8x1xf32>
    %117 = vector.shape_cast %116 : vector<1x8x1xf32> to vector<8x1xf32>
    %118 = vector.shape_cast %117 : vector<8x1xf32> to vector<1x8x1xf32>
    %119 = vector.shape_cast %115 : vector<2x8xf32> to vector<2x1x8xf32>
    %120 = vector.broadcast %118 : vector<1x8x1xf32> to vector<2x8x8xf32>
    %121 = vector.broadcast %119 : vector<2x1x8xf32> to vector<2x8x8xf32>
    %122 = arith.mulf %120, %121 : vector<2x8x8xf32>
    %123 = arith.addf %113, %122 : vector<2x8x8xf32>
    %cst = arith.constant dense<0.000000e+00> : vector<2x8xf32>
    %124 = vector.multi_reduction <add>, %123, %cst [2] : vector<2x8x8xf32> to vector<2x8xf32>
    %125 = vector.shape_cast %124 : vector<2x8xf32> to vector<2x8x1xf32>
    %cst_7 = arith.constant dense<0.000000e+00> : vector<8x1xf32>
    %126 = vector.multi_reduction <add>, %125, %cst_7 [0] : vector<2x8x1xf32> to vector<8x1xf32>
    %127 = arith.mulf %123, %123 : vector<2x8x8xf32>
    %cst_8 = arith.constant dense<0.000000e+00> : vector<2x8xf32>
    %128 = vector.multi_reduction <add>, %127, %cst_8 [2] : vector<2x8x8xf32> to vector<2x8xf32>
    %129 = vector.shape_cast %128 : vector<2x8xf32> to vector<2x8x1xf32>
    %cst_9 = arith.constant dense<0.000000e+00> : vector<8x1xf32>
    %130 = vector.multi_reduction <add>, %129, %cst_9 [0] : vector<2x8x1xf32> to vector<8x1xf32>
    %c0_10 = arith.constant 0 : index
    %c0_11 = arith.constant 0 : index
    %c0_12 = arith.constant 0 : index
    %131 = vector.load %arg5[%c0_10, %c0_11, %c0_12] : memref<2x8x1xf32, #tpu.memory_space<vmem>>, vector<1x8x1xf32>
    %132 = vector.shape_cast %131 : vector<1x8x1xf32> to vector<8x1xf32>
    %133 = arith.addf %132, %126 : vector<8x1xf32>
    %c0_13 = arith.constant 0 : index
    %c0_14 = arith.constant 0 : index
    %c0_15 = arith.constant 0 : index
    %134 = vector.load %arg5[%c0_13, %c0_14, %c0_15] : memref<2x8x1xf32, #tpu.memory_space<vmem>>, vector<1x8x1xf32>
    %135 = vector.shape_cast %134 : vector<1x8x1xf32> to vector<8x1xf32>
    %136 = vector.shape_cast %133 : vector<8x1xf32> to vector<1x8x1xf32>
    tpu.vector_store %arg5[%c0_13, %c0_14, %c0_15], %136 {strides = array<i32>} : memref<2x8x1xf32, #tpu.memory_space<vmem>>, vector<1x8x1xf32>,
    %c1 = arith.constant 1 : index
    %c0_16 = arith.constant 0 : index
    %c0_17 = arith.constant 0 : index
    %137 = vector.load %arg5[%c1, %c0_16, %c0_17] : memref<2x8x1xf32, #tpu.memory_space<vmem>>, vector<1x8x1xf32>
    %138 = vector.shape_cast %137 : vector<1x8x1xf32> to vector<8x1xf32>
    %139 = arith.addf %138, %130 : vector<8x1xf32>
    %c1_18 = arith.constant 1 : index
    %c0_19 = arith.constant 0 : index
    %c0_20 = arith.constant 0 : index
    %140 = vector.load %arg5[%c1_18, %c0_19, %c0_20] : memref<2x8x1xf32, #tpu.memory_space<vmem>>, vector<1x8x1xf32>
    %141 = vector.shape_cast %140 : vector<1x8x1xf32> to vector<8x1xf32>
    %142 = vector.shape_cast %139 : vector<8x1xf32> to vector<1x8x1xf32>
    tpu.vector_store %arg5[%c1_18, %c0_19, %c0_20], %142 {strides = array<i32>} : memref<2x8x1xf32, #tpu.memory_space<vmem>>, vector<1x8x1xf32>,
    %c0_i32_21 = arith.constant 0 : i32
    %143 = arith.cmpi eq, %arg1, %c0_i32_21 : i32
    %144 = arith.extui %143 : i1 to i32
    %c0_i32_22 = arith.constant 0 : i32
    %145 = arith.cmpi ne, %144, %c0_i32_22 : i32
    scf.if %145 {
      %c0_23 = arith.constant 0 : index
      %c0_24 = arith.constant 0 : index
      %c0_25 = arith.constant 0 : index
      %146 = vector.load %arg5[%c0_23, %c0_24, %c0_25] : memref<2x8x1xf32, #tpu.memory_space<vmem>>, vector<2x8x1xf32>
      %c0_26 = arith.constant 0 : index
      %c0_27 = arith.constant 0 : index
      %c0_28 = arith.constant 0 : index
      %c0_29 = arith.constant 0 : index
      %147 = vector.load %arg4[%c0_26, %c0_27, %c0_28, %c0_29] : memref<1x2x8x1xf32, #tpu.memory_space<vmem>>, vector<1x2x8x1xf32>
      %148 = vector.shape_cast %147 : vector<1x2x8x1xf32> to vector<2x8x1xf32>
      %149 = vector.shape_cast %146 : vector<2x8x1xf32> to vector<1x2x8x1xf32>
      tpu.vector_store %arg4[%c0_26, %c0_27, %c0_28, %c0_29], %149 {strides = array<i32>} : memref<1x2x8x1xf32, #tpu.memory_space<vmem>>, vector<1x2x8x1xf32>,
    } else {
    }
    return
  }
  func.func @transform_0(%arg0: i32, %arg1: i32) -> (i32, i32, i32, i32) {
    %c1_i32 = arith.constant 1 : i32
    %0 = arith.muli %arg0, %c1_i32 : i32
    %1 = arith.addi %0, %arg1 : i32
    %c0_i32 = arith.constant 0 : i32
    %c0_i32_0 = arith.constant 0 : i32
    %c0_i32_1 = arith.constant 0 : i32
    %c0_i32_2 = arith.constant 0 : i32
    return %1, %c0_i32, %c0_i32_0, %c0_i32_1 : i32, i32, i32, i32
  }
  func.func @transform_1(%arg0: i32, %arg1: i32) -> (i32, i32, i32) {
    %c0_i32 = arith.constant 0 : i32
    %c0_i32_0 = arith.constant 0 : i32
    %c0_i32_1 = arith.constant 0 : i32
    %c0_i32_2 = arith.constant 0 : i32
    return %c0_i32, %c0_i32_0, %c0_i32_1 : i32, i32, i32
  }
  func.func @transform_2(%arg0: i32, %arg1: i32) -> (i32, i32, i32, i32) {
    %c0_i32 = arith.constant 0 : i32
    %c0_i32_0 = arith.constant 0 : i32
    %c0_i32_1 = arith.constant 0 : i32
    %c0_i32_2 = arith.constant 0 : i32
    return %arg0, %c0_i32, %c0_i32_0, %c0_i32_1 : i32, i32, i32, i32
  }
}

module attributes {stable_mosaic.version = 11 : i64} {
  func.func @_apply_kernel(%arg0: i32, %arg1: memref<1x2x8x1xf32, #tpu.memory_space<vmem>>, %arg2: memref<2x4x2x9xf32, #tpu.memory_space<vmem>>, %arg3: memref<12x8x1xf32, #tpu.memory_space<vmem>>, %arg4: memref<8x1xf32, #tpu.memory_space<vmem>>, %arg5: memref<8x1xf32, #tpu.memory_space<vmem>>, %arg6: memref<2x8x8xf32, #tpu.memory_space<vmem>>) attributes {dimension_semantics = [#tpu.dimension_semantics<parallel>], iteration_bounds = array<i64: 1>, scalar_prefetch = 0 : i64, scratch_operands = 0 : i64, tpu.core_type = #tpu.core_type<tc>, window_params = [{pipeline_mode = #tpu.pipeline_mode<synchronous>, transform_indices = @transform_0, window_bounds = array<i64: 1, 2, 8, 1>}, {transform_indices = @transform_1, window_bounds = array<i64: 2, 4, 2, 9>}, {pipeline_mode = #tpu.pipeline_mode<synchronous>, transform_indices = @transform_2, window_bounds = array<i64: 12, 8, 1>}, {pipeline_mode = #tpu.pipeline_mode<synchronous>, transform_indices = @transform_3, window_bounds = array<i64: 8, 1>}, {pipeline_mode = #tpu.pipeline_mode<synchronous>, transform_indices = @transform_4, window_bounds = array<i64: 8, 1>}, {transform_indices = @transform_5, window_bounds = array<i64: 2, 8, 8>}]} {
    %c0 = arith.constant 0 : index
    %c0_0 = arith.constant 0 : index
    %c0_1 = arith.constant 0 : index
    %c0_2 = arith.constant 0 : index
    %0 = vector.load %arg1[%c0, %c0_0, %c0_1, %c0_2] : memref<1x2x8x1xf32, #tpu.memory_space<vmem>>, vector<1x2x8x1xf32>
    %cst = arith.constant dense<0.000000e+00> : vector<2x8x1xf32>
    %1 = vector.multi_reduction <add>, %0, %cst [0] : vector<1x2x8x1xf32> to vector<2x8x1xf32>
    %2 = vector.extract_strided_slice %1 {offsets = [0, 0, 0], sizes = [1, 8, 1], strides = [1, 1, 1]} : vector<2x8x1xf32> to vector<1x8x1xf32>
    %3 = vector.shape_cast %2 : vector<1x8x1xf32> to vector<8x1xf32>
    %cst_3 = arith.constant 6.250000e-02 : f32
    %4 = vector.broadcast %cst_3 : f32 to vector<8x1xf32>
    %5 = arith.mulf %3, %4 : vector<8x1xf32>
    %6 = vector.extract_strided_slice %1 {offsets = [1, 0, 0], sizes = [1, 8, 1], strides = [1, 1, 1]} : vector<2x8x1xf32> to vector<1x8x1xf32>
    %7 = vector.shape_cast %6 : vector<1x8x1xf32> to vector<8x1xf32>
    %cst_4 = arith.constant 6.250000e-02 : f32
    %8 = vector.broadcast %cst_4 : f32 to vector<8x1xf32>
    %9 = arith.mulf %7, %8 : vector<8x1xf32>
    %10 = arith.mulf %5, %5 : vector<8x1xf32>
    %11 = arith.subf %9, %10 : vector<8x1xf32>
    %cst_5 = arith.constant 0.000000e+00 : f32
    %12 = vector.broadcast %cst_5 : f32 to vector<8x1xf32>
    %13 = arith.maximumf %11, %12 : vector<8x1xf32>
    %c0_6 = arith.constant 0 : index
    %c0_7 = arith.constant 0 : index
    %14 = vector.load %arg4[%c0_6, %c0_7] : memref<8x1xf32, #tpu.memory_space<vmem>>, vector<8x1xf32>
    %cst_8 = arith.constant 9.99999974E-6 : f32
    %15 = vector.broadcast %cst_8 : f32 to vector<8x1xf32>
    %16 = arith.addf %13, %15 : vector<8x1xf32>
    %17 = math.rsqrt %16 : vector<8x1xf32>
    %18 = arith.mulf %14, %17 : vector<8x1xf32>
    %c0_9 = arith.constant 0 : index
    %c0_10 = arith.constant 0 : index
    %19 = vector.load %arg5[%c0_9, %c0_10] : memref<8x1xf32, #tpu.memory_space<vmem>>, vector<8x1xf32>
    %20 = arith.mulf %5, %18 : vector<8x1xf32>
    %21 = arith.subf %19, %20 : vector<8x1xf32>
    %c0_11 = arith.constant 0 : index
    %c0_12 = arith.constant 0 : index
    %c0_13 = arith.constant 0 : index
    %c0_14 = arith.constant 0 : index
    %22 = vector.load %arg2[%c0_11, %c0_12, %c0_13, %c0_14] : memref<2x4x2x9xf32, #tpu.memory_space<vmem>>, vector<2x4x2x9xf32>
    %c0_15 = arith.constant 0 : index
    %c0_16 = arith.constant 0 : index
    %c0_17 = arith.constant 0 : index
    %23 = vector.load %arg3[%c0_15, %c0_16, %c0_17] : memref<12x8x1xf32, #tpu.memory_space<vmem>>, vector<12x8x1xf32>
    %24 = vector.extract_strided_slice %22 {offsets = [0, 0, 0, 0], sizes = [2, 1, 1, 8], strides = [1, 1, 1, 1]} : vector<2x4x2x9xf32> to vector<2x1x1x8xf32>
    %25 = vector.shape_cast %24 : vector<2x1x1x8xf32> to vector<2x8xf32>
    %26 = vector.extract_strided_slice %23 {offsets = [0, 0, 0], sizes = [1, 8, 1], strides = [1, 1, 1]} : vector<12x8x1xf32> to vector<1x8x1xf32>
    %27 = vector.shape_cast %26 : vector<1x8x1xf32> to vector<8x1xf32>
    %28 = vector.shape_cast %27 : vector<8x1xf32> to vector<1x8x1xf32>
    %29 = vector.shape_cast %25 : vector<2x8xf32> to vector<2x1x8xf32>
    %30 = vector.broadcast %28 : vector<1x8x1xf32> to vector<2x8x8xf32>
    %31 = vector.broadcast %29 : vector<2x1x8xf32> to vector<2x8x8xf32>
    %32 = arith.mulf %30, %31 : vector<2x8x8xf32>
    %33 = vector.extract_strided_slice %22 {offsets = [0, 0, 1, 0], sizes = [2, 1, 1, 8], strides = [1, 1, 1, 1]} : vector<2x4x2x9xf32> to vector<2x1x1x8xf32>
    %34 = vector.shape_cast %33 : vector<2x1x1x8xf32> to vector<2x8xf32>
    %35 = vector.extract_strided_slice %23 {offsets = [1, 0, 0], sizes = [1, 8, 1], strides = [1, 1, 1]} : vector<12x8x1xf32> to vector<1x8x1xf32>
    %36 = vector.shape_cast %35 : vector<1x8x1xf32> to vector<8x1xf32>
    %37 = vector.shape_cast %36 : vector<8x1xf32> to vector<1x8x1xf32>
    %38 = vector.shape_cast %34 : vector<2x8xf32> to vector<2x1x8xf32>
    %39 = vector.broadcast %37 : vector<1x8x1xf32> to vector<2x8x8xf32>
    %40 = vector.broadcast %38 : vector<2x1x8xf32> to vector<2x8x8xf32>
    %41 = arith.mulf %39, %40 : vector<2x8x8xf32>
    %42 = arith.addf %32, %41 : vector<2x8x8xf32>
    %43 = vector.extract_strided_slice %22 {offsets = [0, 0, 0, 1], sizes = [2, 1, 1, 8], strides = [1, 1, 1, 1]} : vector<2x4x2x9xf32> to vector<2x1x1x8xf32>
    %44 = vector.shape_cast %43 : vector<2x1x1x8xf32> to vector<2x8xf32>
    %45 = vector.extract_strided_slice %23 {offsets = [2, 0, 0], sizes = [1, 8, 1], strides = [1, 1, 1]} : vector<12x8x1xf32> to vector<1x8x1xf32>
    %46 = vector.shape_cast %45 : vector<1x8x1xf32> to vector<8x1xf32>
    %47 = vector.shape_cast %46 : vector<8x1xf32> to vector<1x8x1xf32>
    %48 = vector.shape_cast %44 : vector<2x8xf32> to vector<2x1x8xf32>
    %49 = vector.broadcast %47 : vector<1x8x1xf32> to vector<2x8x8xf32>
    %50 = vector.broadcast %48 : vector<2x1x8xf32> to vector<2x8x8xf32>
    %51 = arith.mulf %49, %50 : vector<2x8x8xf32>
    %52 = arith.addf %42, %51 : vector<2x8x8xf32>
    %53 = vector.extract_strided_slice %22 {offsets = [0, 1, 0, 0], sizes = [2, 1, 1, 8], strides = [1, 1, 1, 1]} : vector<2x4x2x9xf32> to vector<2x1x1x8xf32>
    %54 = vector.shape_cast %53 : vector<2x1x1x8xf32> to vector<2x8xf32>
    %55 = vector.extract_strided_slice %23 {offsets = [3, 0, 0], sizes = [1, 8, 1], strides = [1, 1, 1]} : vector<12x8x1xf32> to vector<1x8x1xf32>
    %56 = vector.shape_cast %55 : vector<1x8x1xf32> to vector<8x1xf32>
    %57 = vector.shape_cast %56 : vector<8x1xf32> to vector<1x8x1xf32>
    %58 = vector.shape_cast %54 : vector<2x8xf32> to vector<2x1x8xf32>
    %59 = vector.broadcast %57 : vector<1x8x1xf32> to vector<2x8x8xf32>
    %60 = vector.broadcast %58 : vector<2x1x8xf32> to vector<2x8x8xf32>
    %61 = arith.mulf %59, %60 : vector<2x8x8xf32>
    %62 = arith.addf %52, %61 : vector<2x8x8xf32>
    %63 = vector.extract_strided_slice %22 {offsets = [0, 1, 1, 0], sizes = [2, 1, 1, 8], strides = [1, 1, 1, 1]} : vector<2x4x2x9xf32> to vector<2x1x1x8xf32>
    %64 = vector.shape_cast %63 : vector<2x1x1x8xf32> to vector<2x8xf32>
    %65 = vector.extract_strided_slice %23 {offsets = [4, 0, 0], sizes = [1, 8, 1], strides = [1, 1, 1]} : vector<12x8x1xf32> to vector<1x8x1xf32>
    %66 = vector.shape_cast %65 : vector<1x8x1xf32> to vector<8x1xf32>
    %67 = vector.shape_cast %66 : vector<8x1xf32> to vector<1x8x1xf32>
    %68 = vector.shape_cast %64 : vector<2x8xf32> to vector<2x1x8xf32>
    %69 = vector.broadcast %67 : vector<1x8x1xf32> to vector<2x8x8xf32>
    %70 = vector.broadcast %68 : vector<2x1x8xf32> to vector<2x8x8xf32>
    %71 = arith.mulf %69, %70 : vector<2x8x8xf32>
    %72 = arith.addf %62, %71 : vector<2x8x8xf32>
    %73 = vector.extract_strided_slice %22 {offsets = [0, 1, 0, 1], sizes = [2, 1, 1, 8], strides = [1, 1, 1, 1]} : vector<2x4x2x9xf32> to vector<2x1x1x8xf32>
    %74 = vector.shape_cast %73 : vector<2x1x1x8xf32> to vector<2x8xf32>
    %75 = vector.extract_strided_slice %23 {offsets = [5, 0, 0], sizes = [1, 8, 1], strides = [1, 1, 1]} : vector<12x8x1xf32> to vector<1x8x1xf32>
    %76 = vector.shape_cast %75 : vector<1x8x1xf32> to vector<8x1xf32>
    %77 = vector.shape_cast %76 : vector<8x1xf32> to vector<1x8x1xf32>
    %78 = vector.shape_cast %74 : vector<2x8xf32> to vector<2x1x8xf32>
    %79 = vector.broadcast %77 : vector<1x8x1xf32> to vector<2x8x8xf32>
    %80 = vector.broadcast %78 : vector<2x1x8xf32> to vector<2x8x8xf32>
    %81 = arith.mulf %79, %80 : vector<2x8x8xf32>
    %82 = arith.addf %72, %81 : vector<2x8x8xf32>
    %83 = vector.extract_strided_slice %22 {offsets = [0, 2, 0, 0], sizes = [2, 1, 1, 8], strides = [1, 1, 1, 1]} : vector<2x4x2x9xf32> to vector<2x1x1x8xf32>
    %84 = vector.shape_cast %83 : vector<2x1x1x8xf32> to vector<2x8xf32>
    %85 = vector.extract_strided_slice %23 {offsets = [6, 0, 0], sizes = [1, 8, 1], strides = [1, 1, 1]} : vector<12x8x1xf32> to vector<1x8x1xf32>
    %86 = vector.shape_cast %85 : vector<1x8x1xf32> to vector<8x1xf32>
    %87 = vector.shape_cast %86 : vector<8x1xf32> to vector<1x8x1xf32>
    %88 = vector.shape_cast %84 : vector<2x8xf32> to vector<2x1x8xf32>
    %89 = vector.broadcast %87 : vector<1x8x1xf32> to vector<2x8x8xf32>
    %90 = vector.broadcast %88 : vector<2x1x8xf32> to vector<2x8x8xf32>
    %91 = arith.mulf %89, %90 : vector<2x8x8xf32>
    %92 = arith.addf %82, %91 : vector<2x8x8xf32>
    %93 = vector.extract_strided_slice %22 {offsets = [0, 2, 1, 0], sizes = [2, 1, 1, 8], strides = [1, 1, 1, 1]} : vector<2x4x2x9xf32> to vector<2x1x1x8xf32>
    %94 = vector.shape_cast %93 : vector<2x1x1x8xf32> to vector<2x8xf32>
    %95 = vector.extract_strided_slice %23 {offsets = [7, 0, 0], sizes = [1, 8, 1], strides = [1, 1, 1]} : vector<12x8x1xf32> to vector<1x8x1xf32>
    %96 = vector.shape_cast %95 : vector<1x8x1xf32> to vector<8x1xf32>
    %97 = vector.shape_cast %96 : vector<8x1xf32> to vector<1x8x1xf32>
    %98 = vector.shape_cast %94 : vector<2x8xf32> to vector<2x1x8xf32>
    %99 = vector.broadcast %97 : vector<1x8x1xf32> to vector<2x8x8xf32>
    %100 = vector.broadcast %98 : vector<2x1x8xf32> to vector<2x8x8xf32>
    %101 = arith.mulf %99, %100 : vector<2x8x8xf32>
    %102 = arith.addf %92, %101 : vector<2x8x8xf32>
    %103 = vector.extract_strided_slice %22 {offsets = [0, 2, 0, 1], sizes = [2, 1, 1, 8], strides = [1, 1, 1, 1]} : vector<2x4x2x9xf32> to vector<2x1x1x8xf32>
    %104 = vector.shape_cast %103 : vector<2x1x1x8xf32> to vector<2x8xf32>
    %105 = vector.extract_strided_slice %23 {offsets = [8, 0, 0], sizes = [1, 8, 1], strides = [1, 1, 1]} : vector<12x8x1xf32> to vector<1x8x1xf32>
    %106 = vector.shape_cast %105 : vector<1x8x1xf32> to vector<8x1xf32>
    %107 = vector.shape_cast %106 : vector<8x1xf32> to vector<1x8x1xf32>
    %108 = vector.shape_cast %104 : vector<2x8xf32> to vector<2x1x8xf32>
    %109 = vector.broadcast %107 : vector<1x8x1xf32> to vector<2x8x8xf32>
    %110 = vector.broadcast %108 : vector<2x1x8xf32> to vector<2x8x8xf32>
    %111 = arith.mulf %109, %110 : vector<2x8x8xf32>
    %112 = arith.addf %102, %111 : vector<2x8x8xf32>
    %113 = vector.extract_strided_slice %22 {offsets = [0, 3, 0, 0], sizes = [2, 1, 1, 8], strides = [1, 1, 1, 1]} : vector<2x4x2x9xf32> to vector<2x1x1x8xf32>
    %114 = vector.shape_cast %113 : vector<2x1x1x8xf32> to vector<2x8xf32>
    %115 = vector.extract_strided_slice %23 {offsets = [9, 0, 0], sizes = [1, 8, 1], strides = [1, 1, 1]} : vector<12x8x1xf32> to vector<1x8x1xf32>
    %116 = vector.shape_cast %115 : vector<1x8x1xf32> to vector<8x1xf32>
    %117 = vector.shape_cast %116 : vector<8x1xf32> to vector<1x8x1xf32>
    %118 = vector.shape_cast %114 : vector<2x8xf32> to vector<2x1x8xf32>
    %119 = vector.broadcast %117 : vector<1x8x1xf32> to vector<2x8x8xf32>
    %120 = vector.broadcast %118 : vector<2x1x8xf32> to vector<2x8x8xf32>
    %121 = arith.mulf %119, %120 : vector<2x8x8xf32>
    %122 = arith.addf %112, %121 : vector<2x8x8xf32>
    %123 = vector.extract_strided_slice %22 {offsets = [0, 3, 1, 0], sizes = [2, 1, 1, 8], strides = [1, 1, 1, 1]} : vector<2x4x2x9xf32> to vector<2x1x1x8xf32>
    %124 = vector.shape_cast %123 : vector<2x1x1x8xf32> to vector<2x8xf32>
    %125 = vector.extract_strided_slice %23 {offsets = [10, 0, 0], sizes = [1, 8, 1], strides = [1, 1, 1]} : vector<12x8x1xf32> to vector<1x8x1xf32>
    %126 = vector.shape_cast %125 : vector<1x8x1xf32> to vector<8x1xf32>
    %127 = vector.shape_cast %126 : vector<8x1xf32> to vector<1x8x1xf32>
    %128 = vector.shape_cast %124 : vector<2x8xf32> to vector<2x1x8xf32>
    %129 = vector.broadcast %127 : vector<1x8x1xf32> to vector<2x8x8xf32>
    %130 = vector.broadcast %128 : vector<2x1x8xf32> to vector<2x8x8xf32>
    %131 = arith.mulf %129, %130 : vector<2x8x8xf32>
    %132 = arith.addf %122, %131 : vector<2x8x8xf32>
    %133 = vector.extract_strided_slice %22 {offsets = [0, 3, 0, 1], sizes = [2, 1, 1, 8], strides = [1, 1, 1, 1]} : vector<2x4x2x9xf32> to vector<2x1x1x8xf32>
    %134 = vector.shape_cast %133 : vector<2x1x1x8xf32> to vector<2x8xf32>
    %135 = vector.extract_strided_slice %23 {offsets = [11, 0, 0], sizes = [1, 8, 1], strides = [1, 1, 1]} : vector<12x8x1xf32> to vector<1x8x1xf32>
    %136 = vector.shape_cast %135 : vector<1x8x1xf32> to vector<8x1xf32>
    %137 = vector.shape_cast %136 : vector<8x1xf32> to vector<1x8x1xf32>
    %138 = vector.shape_cast %134 : vector<2x8xf32> to vector<2x1x8xf32>
    %139 = vector.broadcast %137 : vector<1x8x1xf32> to vector<2x8x8xf32>
    %140 = vector.broadcast %138 : vector<2x1x8xf32> to vector<2x8x8xf32>
    %141 = arith.mulf %139, %140 : vector<2x8x8xf32>
    %142 = arith.addf %132, %141 : vector<2x8x8xf32>
    %143 = vector.shape_cast %18 : vector<8x1xf32> to vector<1x8x1xf32>
    %144 = vector.broadcast %143 : vector<1x8x1xf32> to vector<2x8x8xf32>
    %145 = arith.mulf %142, %144 : vector<2x8x8xf32>
    %146 = vector.shape_cast %21 : vector<8x1xf32> to vector<1x8x1xf32>
    %147 = vector.broadcast %146 : vector<1x8x1xf32> to vector<2x8x8xf32>
    %148 = arith.addf %145, %147 : vector<2x8x8xf32>
    %cst_18 = arith.constant 5.000000e-01 : f32
    %149 = vector.broadcast %cst_18 : f32 to vector<2x8x8xf32>
    %150 = arith.mulf %149, %148 : vector<2x8x8xf32>
    %cst_19 = arith.constant 0.707106769 : f32
    %151 = vector.broadcast %cst_19 : f32 to vector<2x8x8xf32>
    %152 = arith.mulf %148, %151 : vector<2x8x8xf32>
    %153 = math.erf %152 : vector<2x8x8xf32>
    %cst_20 = arith.constant 1.000000e+00 : f32
    %154 = vector.broadcast %cst_20 : f32 to vector<2x8x8xf32>
    %155 = arith.addf %154, %153 : vector<2x8x8xf32>
    %156 = arith.mulf %150, %155 : vector<2x8x8xf32>
    %c0_21 = arith.constant 0 : index
    %c0_22 = arith.constant 0 : index
    %c0_23 = arith.constant 0 : index
    %157 = vector.load %arg6[%c0_21, %c0_22, %c0_23] : memref<2x8x8xf32, #tpu.memory_space<vmem>>, vector<2x8x8xf32>
    tpu.vector_store %arg6[%c0_21, %c0_22, %c0_23], %156 {strides = array<i32>} : memref<2x8x8xf32, #tpu.memory_space<vmem>>, vector<2x8x8xf32>,
    return
  }
  func.func @transform_0(%arg0: i32) -> (i32, i32, i32, i32) {
    %c0_i32 = arith.constant 0 : i32
    %c0_i32_0 = arith.constant 0 : i32
    %c0_i32_1 = arith.constant 0 : i32
    %c0_i32_2 = arith.constant 0 : i32
    %c0_i32_3 = arith.constant 0 : i32
    return %c0_i32, %c0_i32_0, %c0_i32_1, %c0_i32_2 : i32, i32, i32, i32
  }
  func.func @transform_1(%arg0: i32) -> (i32, i32, i32, i32) {
    %c0_i32 = arith.constant 0 : i32
    %c0_i32_0 = arith.constant 0 : i32
    %c0_i32_1 = arith.constant 0 : i32
    %c0_i32_2 = arith.constant 0 : i32
    return %arg0, %c0_i32, %c0_i32_0, %c0_i32_1 : i32, i32, i32, i32
  }
  func.func @transform_2(%arg0: i32) -> (i32, i32, i32) {
    %c0_i32 = arith.constant 0 : i32
    %c0_i32_0 = arith.constant 0 : i32
    %c0_i32_1 = arith.constant 0 : i32
    %c0_i32_2 = arith.constant 0 : i32
    return %c0_i32, %c0_i32_0, %c0_i32_1 : i32, i32, i32
  }
  func.func @transform_3(%arg0: i32) -> (i32, i32) {
    %c0_i32 = arith.constant 0 : i32
    %c0_i32_0 = arith.constant 0 : i32
    %c0_i32_1 = arith.constant 0 : i32
    return %c0_i32, %c0_i32_0 : i32, i32
  }
  func.func @transform_4(%arg0: i32) -> (i32, i32) {
    %c0_i32 = arith.constant 0 : i32
    %c0_i32_0 = arith.constant 0 : i32
    %c0_i32_1 = arith.constant 0 : i32
    return %c0_i32, %c0_i32_0 : i32, i32
  }
  func.func @transform_5(%arg0: i32) -> (i32, i32, i32) {
    %c0_i32 = arith.constant 0 : i32
    %c0_i32_0 = arith.constant 0 : i32
    %c0_i32_1 = arith.constant 0 : i32
    return %arg0, %c0_i32, %c0_i32_0 : i32, i32, i32
  }
}

</mosaic_0001>

<bundles_post_ra>
// kernel: conv_bn_gelu_forward.2
= control target key start
LH: loop header
LB: loop body
LE: loop exit
PB: predicated region body
PF: predicated region fallthrough
CT: control target
= control target key end

     0   :  { %v312_v0 = vmov 0   ;;  %v68_v3 = vlaneseq  ;;  %s313_s13 = smov 127   ;;  %vm265_vm0 = vcmask 64512   ;;  %vm40_vm1 = vcmask 7168   ;;  %s450_s1 = inlined_call_operand.vmem [shape: f32[12,8,1], index: 1, kind: input, shape index: {}]   ;;  %s451_s0 = inlined_call_operand.vmem [shape: f32[2,4,2,9], index: 0, kind: input, shape index: {}]   ;;  %s452_s2 = inlined_call_operand.vmem [shape: f32[1,2,8,1], index: 2, kind: output, shape index: {}]  }
   0x1   :  { %311 = vset.pattern.permute.xlu1 %v312_v0  ;;  %310 = vset.pattern.permute.xlu0 %v312_v0  ;;  %v59_v1 = vld [vmem:[%s450_s1 + $0x40] sm:$0xff]  ;;  %v53_v2 = vld [vmem:[%s450_s1 + $0x10] sm:$0xff]  ;;  %v62_v4 = vld [vmem:[%s450_s1 + $0x58] sm:$0xff] }
   0x2   :  { %199 = vperm.xlu1 %311, %v59_v1   ;;  %97 = vperm.xlu0 %310, %v53_v2   ;;  %v56_v5 = vld [vmem:[%s450_s1 + $0x28] sm:$0xff]  ;;  %v69_v6 = vshrl.u32 %v68_v3, 7  ;;  %v51_v8 = vld [vmem:[%s450_s1] sm:$0xff]  ;;  %v54_v14 = vld [vmem:[%s450_s1 + $0x18] sm:$0xff] }
   0x3   :  { %v52_v7 = vld [vmem:[%s450_s1 + $0x8] sm:$0xff]  ;;  %v43_v10 = vld [vmem:[%s451_s0] sm:$0x3]  ;;  %v367_v16 = vld [vmem:[%s451_s0 + $0x4] sm:$0x3] }
   0x4   :  { %v348_v9 = vsub.s32 1, %v69_v6  ;;  %v47_v11 = vld [vmem:[%s451_s0 + $0x8] sm:$0x3]  ;;  %v55_v15 = vld [vmem:[%s450_s1 + $0x20] sm:$0xff]  ;;  %v377_v18 = vld [vmem:[%s451_s0 + $0xa] sm:$0x3] }
   0x5   :  { %v372_v17 = vld [vmem:[%s451_s0 + $0x2] sm:$0x3]  ;;  %v382_v19 = vld [vmem:[%s451_s0 + $0xc] sm:$0x3]  ;;  %v57_v23 = vld [vmem:[%s450_s1 + $0x30] sm:$0xff]  ;;  %v70_v26 = vsub.s32 0, %v69_v6 }
   0x6   :  { %250 = vperm.xlu1 %311, %v62_v4   ;;  %148 = vperm.xlu0 %310, %v56_v5   ;;  %v86_v12 = vrot.slane %v43_v10, %v348_v9  ;;  %v90_v13 = vrot.slane %v47_v11, %v348_v9  ;;  %v137_v20 = vrot.slane %v372_v17, %v348_v9  ;;  %v58_v24 = vld [vmem:[%s450_s1 + $0x38] sm:$0xff]  ;;  %v407_v41 = vld [vmem:[%s451_s0 + $0x6] sm:$0x3]  ;;  %v412_v42 = vld [vmem:[%s451_s0 + $0xe] sm:$0x3] }
   0x7   :  { %v141_v21 = vrot.slane %v377_v18, %v348_v9  ;;  %v188_v22 = vrot.slane %v367_v16, %v348_v9  ;;  %v192_v25 = vrot.slane %v382_v19, %v348_v9  ;;  %v71_v27 = vrot.slane %v43_v10, %v70_v26  ;;  %v61_v45 = vld [vmem:[%s450_s1 + $0x50] sm:$0xff]  ;;  %v60_v46 = vld [vmem:[%s450_s1 + $0x48] sm:$0xff] }
   0x8   :  { %v75_v28 = vrot.slane %v47_v11, %v70_v26  ;;  %v120_v33 = vrot.slane %v372_v17, %v70_v26  ;;  %v124_v34 = vrot.slane %v377_v18, %v70_v26  ;;  %v171_v39 = vrot.slane %v367_v16, %v70_v26 }
   0x9   :  { %v175_v40 = vrot.slane %v382_v19, %v70_v26  ;;  %v222_v52 = vrot.slane %v407_v41, %v70_v26  ;;  %v226_v53 = vrot.slane %v412_v42, %v70_v26 }
   0xa   :  { %80 = vperm.xlu1 %311, %v52_v7   ;;  %65 = vperm.xlu0 %310, %v51_v8  }
   0xe   :  { %114 = vperm.xlu0 %310, %v54_v14   ;;  %131 = vperm.xlu1 %311, %v55_v15  }
  0x12   :  { %165 = vperm.xlu0 %310, %v57_v23   ;;  %182 = vperm.xlu1 %311, %v58_v24  }
  0x7d   :  { %v200_v29 = vpop.permute.xlu1 %199  ;;  %v98_v30 = vpop.permute.xlu0 %97 }
  0x7e   :  { %v100_v31 = vmul.f32 %v98_v30, %v71_v27  ;;  %v101_v32 = vmul.f32 %v98_v30, %v75_v28  ;;  %v202_v51 = vmul.f32 %v200_v29, %v171_v39  ;;  %v203_v54 = vmul.f32 %v200_v29, %v175_v40 }
  0x7f   :  { %v243_v30 = vrot.slane %v412_v42, %v348_v9 }
  0x80   :  { %106 = vrot.lane.b32.xlu1 %v101_v32, %s313_s13  ;;  %104 = vrot.lane.b32.xlu0 %v100_v31, %s313_s13  ;;  %v239_v31 = vrot.slane %v407_v41, %v348_v9 }
  0x81   :  { %v251_v35 = vpop.permute.xlu1 %250  ;;  %v149_v36 = vpop.permute.xlu0 %148 }
  0x82   :  { %v151_v37 = vmul.f32 %v149_v36, %v120_v33  ;;  %v152_v38 = vmul.f32 %v149_v36, %v124_v34  ;;  %v253_v57 = vmul.f32 %v251_v35, %v222_v52  ;;  %v254_v58 = vmul.f32 %v251_v35, %v226_v53 }
  0x84   :  { %157 = vrot.lane.b32.xlu1 %v152_v38, %s313_s13  ;;  %155 = vrot.lane.b32.xlu0 %v151_v37, %s313_s13 }
  0x85   :  { %v81_v43 = vpop.permute.xlu1 %80  ;;  %v66_v44 = vpop.permute.xlu0 %65 }
  0x86   :  { %v91_v47 = vmul.f32 %v86_v12, %v81_v43  ;;  %v92_v48 = vmul.f32 %v90_v13, %v81_v43  ;;  %v76_v49 = vmul.f32 %v71_v27, %v66_v44  ;;  %v77_v50 = vmul.f32 %v75_v28, %v66_v44 }
  0x88   :  { %233 = vperm.xlu1 %311, %v61_v45   ;;  %216 = vperm.xlu0 %310, %v60_v46   ;;  %v94_v55 = vadd.f32 %v92_v48, %v77_v50  ;;  %v93_v56 = vadd.f32 %v91_v47, %v76_v49  ;;  %v314_v48 = vmov 0.0  }
  0x89   :  { %v115_v59 = vpop.permute.xlu0 %114  ;;  %v132_v60 = vpop.permute.xlu1 %131  ;;  %41 = vst.msk [vmem:[#allocation2] sm:$0xff] %vm40_vm1, %v314_v48  ;;  %42 = vst.msk [vmem:[#allocation2 + $0x8] sm:$0xff] %vm40_vm1, %v314_v48 }
  0x8a   :  { %v125_v1 = vmul.f32 %v120_v33, %v115_v59  ;;  %v126_v2 = vmul.f32 %v124_v34, %v115_v59  ;;  %v142_v5 = vmul.f32 %v137_v20, %v132_v60  ;;  %v143_v6 = vmul.f32 %v141_v21, %v132_v60 }
  0x8c   :  { %208 = vrot.lane.b32.xlu1 %v203_v54, %s313_s13  ;;  %206 = vrot.lane.b32.xlu0 %v202_v51, %s313_s13 }
  0x8d   :  { %v166_v61 = vpop.permute.xlu0 %165  ;;  %v183_v62 = vpop.permute.xlu1 %182 }
  0x8e   :  { %v176_v14 = vmul.f32 %v171_v39, %v166_v61  ;;  %v177_v15 = vmul.f32 %v175_v40, %v166_v61  ;;  %v193_v23 = vmul.f32 %v188_v22, %v183_v62  ;;  %v194_v24 = vmul.f32 %v192_v25, %v183_v62 }
  0x90   :  { %259 = vrot.lane.b32.xlu1 %v254_v58, %s313_s13  ;;  %257 = vrot.lane.b32.xlu0 %v253_v57, %s313_s13  ;;  %v282_v51 = vld [vmem:[#allocation2] sm:$0xff] }
  0xf2   :  { %v107_v63 = vpop.permute.xlu1 %106  ;;  %v105_v0 = vpop.permute.xlu0 %104 }
  0xf3   :  { %v111_v3 = vadd.f32 %v107_v63, %v94_v55  ;;  %v110_v4 = vadd.f32 %v105_v0, %v93_v56  ;;  %v287_v56 = vld [vmem:[#allocation2 + $0x8] sm:$0xff] }
  0xf5   :  { %v128_v7 = vadd.f32 %v126_v2, %v111_v3  ;;  %v127_v8 = vadd.f32 %v125_v1, %v110_v4 }
  0xf6   :  { %v158_v12 = vpop.permute.xlu1 %157  ;;  %v156_v13 = vpop.permute.xlu0 %155 }
  0xf7   :  { %v145_v10 = vadd.f32 %v143_v6, %v128_v7  ;;  %v144_v11 = vadd.f32 %v142_v5, %v127_v8 }
  0xf9   :  { %v162_v17 = vadd.f32 %v158_v12, %v145_v10  ;;  %v161_v18 = vadd.f32 %v156_v13, %v144_v11 }
  0xfb   :  { %v179_v20 = vadd.f32 %v177_v15, %v162_v17  ;;  %v178_v21 = vadd.f32 %v176_v14, %v161_v18 }
  0xfd   :  { %v196_v26 = vadd.f32 %v194_v24, %v179_v20  ;;  %v195_v27 = vadd.f32 %v193_v23, %v178_v21 }
 0x103   :  { %v234_v28 = vpop.permute.xlu1 %233  ;;  %v217_v29 = vpop.permute.xlu0 %216 }
 0x104   :  { %v227_v16 = vmul.f32 %v222_v52, %v217_v29  ;;  %v228_v22 = vmul.f32 %v226_v53, %v217_v29  ;;  %v244_v19 = vmul.f32 %v239_v31, %v234_v28  ;;  %v245_v25 = vmul.f32 %v243_v30, %v234_v28 }
 0x107   :  { %v209_v32 = vpop.permute.xlu1 %208  ;;  %v207_v33 = vpop.permute.xlu0 %206 }
 0x108   :  { %v213_v34 = vadd.f32 %v209_v32, %v196_v26  ;;  %v212_v35 = vadd.f32 %v207_v33, %v195_v27 }
 0x10a   :  { %v230_v36 = vadd.f32 %v228_v22, %v213_v34  ;;  %v229_v37 = vadd.f32 %v227_v16, %v212_v35 }
 0x10b   :  { %v260_v40 = vpop.permute.xlu1 %259  ;;  %v258_v43 = vpop.permute.xlu0 %257 }
 0x10c   :  { %v247_v38 = vadd.f32 %v245_v25, %v230_v36  ;;  %v246_v39 = vadd.f32 %v244_v19, %v229_v37 }
 0x10e   :  { %v264_v44 = vadd.f32 %v260_v40, %v247_v38  ;;  %v263_v42 = vadd.f32 %v258_v43, %v246_v39 }
 0x110   :  { %v269_v45 = vsel %vm265_vm0, %v264_v44, 0.0  ;;  %v266_v46 = vsel %vm265_vm0, %v263_v42, 0.0  ;;  %v273_v9 = vmul.f32 %v263_v42, %v263_v42  ;;  %v274_v47 = vmul.f32 %v264_v44, %v264_v44 }
 0x111   :  { %270 = vadd.xlane.f32.xlu1 %v269_v45  ;;  %267 = vadd.xlane.f32.xlu0 %v266_v46 }
 0x112   :  { %v275_v41 = vsel %vm265_vm0, %v273_v9, 0.0  ;;  %v278_v49 = vsel %vm265_vm0, %v274_v47, 0.0 }
 0x115   :  { %276 = vadd.xlane.f32.xlu0 %v275_v41 }
 0x119   :  { %279 = vadd.xlane.f32.xlu0 %v278_v49 }
 0x19a   :  { %v271_v50 = vpop.xlane.xlu1 %270  ;;  %v268_v52 = vpop.xlane.xlu0 %267 }
 0x19b   :  { %v272_v53 = vadd.f32 %v271_v50, %v268_v52 }
 0x19d   :  { %v283_v54 = vadd.f32 %v282_v51, %v272_v53 }
 0x19e   :  { %v277_v55 = vpop.xlane.xlu0 %276 }
 0x19f   :  { %285 = vst.msk [vmem:[#allocation2] sm:$0xff] %vm40_vm1, %v283_v54 }
 0x1a2   :  { %v280_v57 = vpop.xlane.xlu0 %279 }
 0x1a3   :  { %v281_v58 = vadd.f32 %v280_v57, %v277_v55 }
 0x1a5   :  { %v288_v59 = vadd.f32 %v287_v56, %v281_v58 }
 0x1a6   :  { %v293_v60 = vld [vmem:[#allocation2] sm:$0xff] }
 0x1a7   :  { %295 = vst.msk [vmem:[%s452_s2] sm:$0xff] %vm40_vm1, %v293_v60  ;;  %289 = vst.msk [vmem:[#allocation2 + $0x8] sm:$0xff] %vm40_vm1, %v288_v59 }
 0x1ae   :  { %v294_v61 = vld [vmem:[#allocation2 + $0x8] sm:$0xff] }
 0x1af   :  { %296 = vst.msk [vmem:[%s452_s2 + $0x8] sm:$0xff] %vm40_vm1, %v294_v61 }

// kernel: conv_bn_gelu_forward.3
= control target key start
LH: loop header
LB: loop body
LE: loop exit
PB: predicated region body
PF: predicated region fallthrough
CT: control target
= control target key end

     0   :  { %v62_v2 = vlaneseq  ;;  %v337_v3 = vmov 0   ;;  %s497_s0 = inlined_call_operand.vmem [shape: f32[1,2,8,1], index: 0, kind: input, shape index: {}]   ;;  %s498_s1 = inlined_call_operand.vmem [shape: f32[2,4,2,9], index: 1, kind: input, shape index: {}]   ;;  %s499_s2 = inlined_call_operand.vmem [shape: f32[12,8,1], index: 2, kind: input, shape index: {}]   ;;  %s500_s3 = inlined_call_operand.vmem [shape: f32[8,1], index: 3, kind: input, shape index: {}]   ;;  %s501_s4 = inlined_call_operand.vmem [shape: f32[8,1], index: 4, kind: input, shape index: {}]   ;;  %s502_s5 = inlined_call_operand.hbm [shape: f32[2,8,8], index: 5, kind: output, shape index: {}]  }
   0x1   :  { %v53_v0 = vld [vmem:[%s499_s2 + $0x40] sm:$0xff]  ;;  %v47_v1 = vld [vmem:[%s499_s2 + $0x10] sm:$0xff]  ;;  %308 = vset.pattern.permute.xlu1 %v337_v3  ;;  %307 = vset.pattern.permute.xlu0 %v337_v3  ;;  %v56_v4 = vld [vmem:[%s499_s2 + $0x58] sm:$0xff] }
   0x2   :  { %193 = vperm.xlu1 %308, %v53_v0   ;;  %91 = vperm.xlu0 %307, %v47_v1   ;;  %v50_v5 = vld [vmem:[%s499_s2 + $0x28] sm:$0xff]  ;;  %v63_v6 = vshrl.u32 %v62_v2, 7  ;;  %v45_v8 = vld [vmem:[%s499_s2] sm:$0xff] }
   0x3   :  { %v46_v7 = vld [vmem:[%s499_s2 + $0x8] sm:$0xff]  ;;  %v393_v9 = vld [vmem:[%s498_s1] sm:$0x3]  ;;  %v403_v12 = vld [vmem:[%s498_s1 + $0x2] sm:$0x3] }
   0x4   :  { %v395_v10 = vsub.s32 1, %v63_v6  ;;  %v41_v11 = vld [vmem:[%s498_s1 + $0x8] sm:$0x3] }
   0x6   :  { %244 = vperm.xlu1 %308, %v56_v4   ;;  %142 = vperm.xlu0 %307, %v50_v5  }
   0x7   :  { %10 = vsyncpa [#allocation3], 0  ;;  %v408_v13 = vld [vmem:[%s498_s1 + $0xa] sm:$0x3]  ;;  %v80_v14 = vrot.slane %v393_v9, %v395_v10  ;;  %v84_v15 = vrot.slane %v41_v11, %v395_v10  ;;  %v131_v16 = vrot.slane %v403_v12, %v395_v10  ;;  %v49_v18 = vld [vmem:[%s499_s2 + $0x20] sm:$0xff]  ;;  %v64_v35 = vsub.s32 0, %v63_v6 }
   0x8   :  { %v135_v17 = vrot.slane %v408_v13, %v395_v10  ;;  %v48_v19 = vld [vmem:[%s499_s2 + $0x18] sm:$0xff]  ;;  %v426_v20 = vld [vmem:[%s498_s1 + $0x4] sm:$0x3]  ;;  %v431_v21 = vld [vmem:[%s498_s1 + $0xc] sm:$0x3]  ;;  %vm283_vm0 = vcmask 64512  }
   0x9   :  { %v182_v22 = vrot.slane %v426_v20, %v395_v10  ;;  %v186_v23 = vrot.slane %v431_v21, %v395_v10  ;;  %v52_v24 = vld [vmem:[%s499_s2 + $0x38] sm:$0xff]  ;;  %v51_v25 = vld [vmem:[%s499_s2 + $0x30] sm:$0xff]  ;;  %v54_v26 = vld [vmem:[%s499_s2 + $0x48] sm:$0xff]  ;;  %v65_v36 = vrot.slane %v393_v9, %v64_v35  ;;  %v69_v37 = vrot.slane %v41_v11, %v64_v35 }
   0xa   :  { %74 = vperm.xlu1 %308, %v46_v7   ;;  %59 = vperm.xlu0 %307, %v45_v8   ;;  %v21_v27 = vld [vmem:[%s497_s0] sm:$0xff]  ;;  %v22_v29 = vld [vmem:[%s497_s0 + $0x8] sm:$0xff]  ;;  %v114_v42 = vrot.slane %v403_v12, %v64_v35  ;;  %v165_v44 = vrot.slane %v426_v20, %v64_v35  ;;  %s338_s0 = smov 127   ;;  %v118_v48 = vrot.slane %v408_v13, %v64_v35  ;;  %v55_v49 = vld [vmem:[%s499_s2 + $0x50] sm:$0xff] }
   0xb   :  { %v25_v28 = vmul.f32 0.0625, %v21_v27  ;;  %v26_v30 = vmul.f32 0.0625, %v22_v29  ;;  %v30_v45 = vld [vmem:[%s500_s3] sm:$0xff]  ;;  %v169_v52 = vrot.slane %v431_v21, %v64_v35  ;;  %v44_v4 = vld [vmem:[%s498_s1 + $0xe] sm:$0x3] }
   0xc   :  { %v40_v61 = vld [vmem:[%s498_s1 + $0x6] sm:$0x3]  ;;  %v220_v6 = vrot.slane %v44_v4, %v64_v35  ;;  %s339_s1 = smov [#allocation2]  }
   0xd   :  { %v27_v31 = vmul.f32 %v25_v28, %v25_v28  ;;  %v34_v2 = vld [vmem:[%s501_s4] sm:$0xff]  ;;  %v216_v3 = vrot.slane %v40_v61, %v64_v35  ;;  %v233_v12 = vrot.slane %v40_v61, %v395_v10  ;;  %s291_s4 = sshll.u32 %s339_s1, 4  ;;  %s292_s4 = int_to_ptr.vmem [resolvable:$true] %s291_s4 }
   0xe   :  { %125 = vperm.xlu1 %308, %v49_v18   ;;  %108 = vperm.xlu0 %307, %v48_v19   ;;  %s315_s14 = scalar_lea.vmem %s292_s4, 256  ;;  %p320_p1 = scmp.lt.s32.totalorder %s292_s4, %s292_s4 }
   0xf   :  { %v28_v32 = vsub.f32 %v26_v30, %v27_v31  ;;  %p316_p0 = scmp.ne.s32.totalorder %s292_s4, %s315_s14  ;;  %p321_p2 = scmp.lt.s32.totalorder %s315_s14, %s315_s14 }
  0x11   :  { %v29_v33 = vmax.f32 %v28_v32, 0.0  ;;  %p322_p3 = por %p321_p2, %p320_p1 }
  0x12   :  { %176 = vperm.xlu1 %308, %v52_v24   ;;  %159 = vperm.xlu0 %307, %v51_v25  }
  0x13   :  { %v31_v34 = vadd.f32 1e-05, %v29_v33  ;;  %p323_p4 = pnand %p322_p3, %p316_p0 }
  0x15   :  { %309 = vrsqrt.f32 %v31_v34 }
  0x16   :  { %210 = vperm.xlu0 %307, %v54_v26  }
  0x22   :  { %v310_v43 = vpop.eup %309 }
  0x23   :  { %v33_v51 = vmul.f32 %v310_v43, %v30_v45 }
  0x25   :  { %v35_v62 = vmul.f32 %v33_v51, %v25_v28 }
  0x27   :  { %v36_v5 = vsub.f32 %v34_v2, %v35_v62 }
  0x7d   :  { %v194_v38 = vpop.permute.xlu1 %193  ;;  %v92_v39 = vpop.permute.xlu0 %91 }
  0x7e   :  { %v94_v40 = vmul.f32 %v92_v39, %v65_v36  ;;  %v95_v41 = vmul.f32 %v92_v39, %v69_v37  ;;  %v196_v53 = vmul.f32 %v194_v38, %v165_v44  ;;  %v197_v63 = vmul.f32 %v194_v38, %v169_v52 }
  0x80   :  { %100 = vrot.lane.b32.xlu1 %v95_v41, %s338_s0  ;;  %98 = vrot.lane.b32.xlu0 %v94_v40, %s338_s0 }
  0x81   :  { %v245_v46 = vpop.permute.xlu1 %244  ;;  %v143_v47 = vpop.permute.xlu0 %142 }
  0x82   :  { %v145_v50 = vmul.f32 %v143_v47, %v114_v42  ;;  %v146_v54 = vmul.f32 %v143_v47, %v118_v48  ;;  %v247_v7 = vmul.f32 %v245_v46, %v216_v3  ;;  %v248_v8 = vmul.f32 %v245_v46, %v220_v6 }
  0x84   :  { %227 = vperm.xlu1 %308, %v55_v49   ;;  %149 = vrot.lane.b32.xlu0 %v145_v50, %s338_s0  ;;  %v237_v50 = vrot.slane %v44_v4, %v395_v10 }
  0x85   :  { %v75_v55 = vpop.permute.xlu1 %74  ;;  %v60_v56 = vpop.permute.xlu0 %59 }
  0x86   :  { %v85_v57 = vmul.f32 %v80_v14, %v75_v55  ;;  %v86_v58 = vmul.f32 %v84_v15, %v75_v55  ;;  %v70_v59 = vmul.f32 %v65_v36, %v60_v56  ;;  %v71_v60 = vmul.f32 %v69_v37, %v60_v56 }
  0x88   :  { %151 = vrot.lane.b32.xlu1 %v146_v54, %s338_s0  ;;  %200 = vrot.lane.b32.xlu0 %v196_v53, %s338_s0  ;;  %v88_v0 = vadd.f32 %v86_v58, %v71_v60  ;;  %v87_v1 = vadd.f32 %v85_v57, %v70_v59 }
  0x89   :  { %v109_v9 = vpop.permute.xlu0 %108  ;;  %v126_v11 = vpop.permute.xlu1 %125 }
  0x8a   :  { %v119_v25 = vmul.f32 %v114_v42, %v109_v9  ;;  %v120_v26 = vmul.f32 %v118_v48, %v109_v9  ;;  %v136_v29 = vmul.f32 %v131_v16, %v126_v11  ;;  %v137_v30 = vmul.f32 %v135_v17, %v126_v11 }
  0x8c   :  { %202 = vrot.lane.b32.xlu1 %v197_v63, %s338_s0  ;;  %261 = vperm.xlu0 %307, %v33_v51  }
  0x8d   :  { %v160_v14 = vpop.permute.xlu0 %159  ;;  %v177_v15 = vpop.permute.xlu1 %176 }
  0x8e   :  { %v170_v36 = vmul.f32 %v165_v44, %v160_v14  ;;  %v187_v38 = vmul.f32 %v182_v22, %v177_v15  ;;  %v171_v47 = vmul.f32 %v169_v52, %v160_v14  ;;  %v188_v44 = vmul.f32 %v186_v23, %v177_v15 }
  0x90   :  { %251 = vrot.lane.b32.xlu0 %v247_v7, %s338_s0  ;;  %268 = vperm.xlu1 %308, %v36_v5  }
  0x91   :  { %v211_v18 = vpop.permute.xlu0 %210 }
  0x92   :  { %v221_v41 = vmul.f32 %v216_v3, %v211_v18  ;;  %v222_v53 = vmul.f32 %v220_v6, %v211_v18 }
  0x94   :  { %253 = vrot.lane.b32.xlu1 %v248_v8, %s338_s0 }
  0xf2   :  { %v101_v19 = vpop.permute.xlu1 %100  ;;  %v99_v24 = vpop.permute.xlu0 %98 }
  0xf3   :  { %v105_v27 = vadd.f32 %v101_v19, %v88_v0  ;;  %v104_v28 = vadd.f32 %v99_v24, %v87_v1 }
  0xf5   :  { %v122_v31 = vadd.f32 %v120_v26, %v105_v27  ;;  %v121_v32 = vadd.f32 %v119_v25, %v104_v28 }
  0xf6   :  { %v150_v35 = vpop.permute.xlu0 %149 }
  0xf7   :  { %v138_v33 = vadd.f32 %v136_v29, %v121_v32  ;;  %v139_v34 = vadd.f32 %v137_v30, %v122_v31 }
  0xf9   :  { %v155_v37 = vadd.f32 %v150_v35, %v138_v33 }
  0xfa   :  { %v201_v40 = vpop.permute.xlu0 %200 }
  0xfb   :  { %v172_v39 = vadd.f32 %v170_v36, %v155_v37 }
  0xfd   :  { %v189_v16 = vadd.f32 %v187_v38, %v172_v39 }
  0xff   :  { %v206_v42 = vadd.f32 %v201_v40, %v189_v16  ;;  %v228_v13 = vpop.permute.xlu1 %227 }
 0x100   :  { %v238_v17 = vmul.f32 %v233_v12, %v228_v13  ;;  %v239_v57 = vmul.f32 %v237_v50, %v228_v13 }
 0x101   :  { %v223_v43 = vadd.f32 %v221_v41, %v206_v42 }
 0x103   :  { %v152_v45 = vpop.permute.xlu1 %151  ;;  %v240_v46 = vadd.f32 %v238_v17, %v223_v43 }
 0x104   :  { %v156_v48 = vadd.f32 %v152_v45, %v139_v34 }
 0x106   :  { %v173_v20 = vadd.f32 %v171_v47, %v156_v48 }
 0x107   :  { %v203_v22 = vpop.permute.xlu1 %202  ;;  %v262_v49 = vpop.permute.xlu0 %261 }
 0x108   :  { %v190_v51 = vadd.f32 %v188_v44, %v173_v20 }
 0x10a   :  { %v207_v54 = vadd.f32 %v203_v22, %v190_v51 }
 0x10b   :  { %v252_v55 = vpop.permute.xlu0 %251  ;;  %v269_v56 = vpop.permute.xlu1 %268 }
 0x10c   :  { %v224_v58 = vadd.f32 %v222_v53, %v207_v54  ;;  %v257_v59 = vadd.f32 %v252_v55, %v240_v46 }
 0x10e   :  { %v264_v60 = vmul.f32 %v262_v49, %v257_v59  ;;  %v241_v52 = vadd.f32 %v239_v57, %v224_v58 }
 0x10f   :  { %v254_v61 = vpop.permute.xlu1 %253 }
 0x110   :  { %v271_v62 = vadd.f32 %v269_v56, %v264_v60  ;;  %v258_v63 = vadd.f32 %v254_v61, %v241_v52 }
 0x112   :  { %v275_v21 = vmul.f32 0.70710677, %v271_v62  ;;  %v265_v23 = vmul.f32 %v262_v49, %v258_v63  ;;  %v273_v2 = vmul.f32 0.5, %v271_v62 }
 0x114   :  { %311 = verf.f32 %v275_v21  ;;  %v272_v0 = vadd.f32 %v269_v56, %v265_v23 }
 0x116   :  { %v276_v1 = vmul.f32 0.70710677, %v272_v0  ;;  %v274_v6 = vmul.f32 0.5, %v272_v0 }
 0x118   :  { %313 = verf.f32 %v276_v1 }
 0x121   :  { %v312_v10 = vpop.eup %311 }
 0x122   :  { %v279_v3 = vadd.f32 1.0, %v312_v10 }
 0x124   :  { %v281_v4 = vmul.f32 %v279_v3, %v273_v2 }
 0x125   :  { %v314_v5 = vpop.eup %313 }
 0x126   :  { %284 = vst.msk [vmem:[#allocation2] sm:$0xff] %vm283_vm0, %v281_v4  ;;  %v280_v7 = vadd.f32 1.0, %v314_v5 }
 0x128   :  { %v282_v8 = vmul.f32 %v280_v7, %v274_v6 }
 0x12a   :  { %285 = vst.msk [vmem:[#allocation2 + $0x8] sm:$0xff] %vm283_vm0, %v282_v8 }
 0x12b   :  { %326 = shalt.err (!%p323_p4)
}
 0x12c   :  { %s340_s15 = smov 128   ;;  %s341_s16 = smov 8  }
 0x12d   :  { %297 = dma.vmem_to_hbm [thread:$0]  %s292_s4, 256, %s502_s5, [#allocation3], %s340_s15, %s340_s15, %s341_s16  }
 0x12e   :  { %335 = dma.done.wait [#allocation3], 256  }
 0x12f   :  { %336 = vsyncadd [#allocation3], 4294967040 }
 0x130   :  { %301 = vsyncpa [#allocation3], 1 }

</bundles_post_ra>
